<compile_context>
chip_gen: v7x
topology: tpu7x:2x2x1
jax: 0.10.0
libtpu: 0.0.40
codegen_flags: <defaults>
</compile_context>

<pallas_src>
import functools

import jax
import jax.numpy as jnp
from jax import lax
from jax.experimental import pallas as pl
from jax.experimental.pallas import tpu as pltpu

_EPS2 = 1e-24                                   # (torch F.normalize eps = 1e-12)**2
_NEG_BIG = -1e30                                # mask fill / running-max init
_TINY = float(jnp.finfo(jnp.float32).tiny)      # pytorch-metric-learning's small_val


# --------------------------------------------------------------------------- #
# pass 1: ln = row_normalize( normalize(F) @ normalize(F).T ), stored as bf16
# --------------------------------------------------------------------------- #
def _prep_kernel(feat_ref, feat_t_ref, ln_ref, ln_t_ref):
    # L2-normalize the feature row tile (rsqrt of clamped sum-of-squares ==
    # x / max(||x||, eps), exactly torch.F.normalize semantics).
    f = feat_ref[...]                                                 # (T1, D) f32
    fn = f * lax.rsqrt(jnp.maximum(jnp.sum(f * f, axis=1, keepdims=True),
                                   jnp.float32(_EPS2)))
    # Same normalization applied column-wise to the pre-transposed full features.
    ft = feat_t_ref[...]                                              # (D, N) f32
    fnt = ft * lax.rsqrt(jnp.maximum(jnp.sum(ft * ft, axis=0, keepdims=True),
                                     jnp.float32(_EPS2)))
    # logits row tile; /temperature omitted (scale-invariant under the row
    # normalization below -> mathematical no-op, per review).  NN-form matmul.
    logits = lax.dot_general(fn, fnt, (((1,), (0,)), ((), ())),
                             preferred_element_type=jnp.float32)      # (T1, N)
    ln = logits * lax.rsqrt(jnp.maximum(
        jnp.sum(logits * logits, axis=1, keepdims=True), jnp.float32(_EPS2)))
    ln_ref[...] = ln.astype(jnp.bfloat16)
    # Pre-transposed copy so pass 2's matmul is plain NN form (no NT / vxpose).
    ln_t_ref[...] = ln.T.astype(jnp.bfloat16)


# --------------------------------------------------------------------------- #
# pass 2: flash-style masked LSE over (row tile, key tile)
# --------------------------------------------------------------------------- #
def _flash_kernel(lab_c_ref, lab_r_ref, ln_ref, ln_t_ref,
                  per_ref, pos_cnt_ref, neg_cnt_ref,
                  m_sc, l_sc, s_sc, c_sc, n_sc, *, inv_temp):
    i = pl.program_id(0)                   # query-row tile  ("parallel")
    k = pl.program_id(1)                   # key-column tile ("arbitrary", last)

    @pl.when(k == 0)
    def _():
        m_sc[...] = jnp.full_like(m_sc, _NEG_BIG)
        l_sc[...] = jnp.zeros_like(l_sc)
        s_sc[...] = jnp.zeros_like(s_sc)
        c_sc[...] = jnp.zeros_like(c_sc)
        n_sc[...] = jnp.zeros_like(n_sc)

    # (T, T) block of mat = (ln @ ln.T) / temperature: bf16 MXU, f32 accumulate,
    # multiply by the precomputed reciprocal temperature (no vector divide).
    mat = lax.dot_general(ln_ref[...], ln_t_ref[...], (((1,), (0,)), ((), ())),
                          preferred_element_type=jnp.float32) * jnp.float32(inv_temp)

    same = lab_c_ref[...] == lab_r_ref[...]                           # (T, T)
    # Global row/col ids for the diagonal mask; only a (T,T) int compare per tile
    # (cost ~1/N of the tile's matmul), not two full N^2 iotas as before.
    tsz = mat.shape[0]
    row_ids = i * tsz + lax.broadcasted_iota(jnp.int32, mat.shape, 0)
    col_ids = k * tsz + lax.broadcasted_iota(jnp.int32, mat.shape, 1)
    keep = row_ids != col_ids              # keep = pos | neg == all off-diagonal
    pos = jnp.logical_and(same, keep)

    # Online masked log-sum-exp over kept entries (single max per tile).
    masked = jnp.where(keep, mat, jnp.float32(_NEG_BIG))
    m_new = jnp.maximum(m_sc[...], jnp.max(masked, axis=1, keepdims=True))
    l_sc[...] = (jnp.exp(m_sc[...] - m_new) * l_sc[...]
                 + jnp.sum(jnp.exp(masked - m_new), axis=1, keepdims=True))
    m_sc[...] = m_new

    # Positive-pair statistics: plain sums of mat (no exp -> no rescaling), and
    # no materialized posf float mask.
    s_sc[...] += jnp.sum(jnp.where(pos, mat, 0.0), axis=1, keepdims=True)
    c_sc[...] += jnp.sum(jnp.where(pos, 1.0, 0.0), axis=1, keepdims=True)
    n_sc[...] += jnp.sum(jnp.where(same, 0.0, 1.0), axis=1, keepdims=True)

    @pl.when(k == pl.num_programs(1) - 1)
    def _():
        c = c_sc[...]
        lse = m_sc[...] + jnp.log(l_sc[...])            # logsumexp over kept cols
        mean_log_prob_pos = s_sc[...] / (c + jnp.float32(_TINY)) - lse
        per_ref[...] = jnp.where(c > 0, -mean_log_prob_pos, 0.0)
        pos_cnt_ref[...] = c
        neg_cnt_ref[...] = n_sc[...]


# --------------------------------------------------------------------------- #
# wrapper
# --------------------------------------------------------------------------- #
def _pick_tile(n):
    for t in (256, 128):
        if n % t == 0:
            return t
    # TODO(synk): pad N up to a multiple of 128 (with masked rows) instead of
    # falling back to one whole-matrix tile for awkward batch sizes.
    return n


def _vmem_limit(est_bytes):
    # Raise v5e's 16 MiB scoped default, never exceed v7x's 64 MiB physical.
    return int(min(64 * 2 ** 20, max(32 * 2 ** 20, est_bytes)))


def supervised_contrastive_loss(feature_vectors, labels, temperature=0.1):
    """feature_vectors: (N, D) float; labels: (N,) or (N, 1) int."""
    labels = labels.reshape(-1).astype(jnp.int32)          # torch.squeeze(labels)
    f = feature_vectors.astype(jnp.float32)
    n, d = f.shape
    lab_col = labels.reshape(n, 1)
    lab_row = labels.reshape(1, n)

    # ---- pass 1: ln (cosine-normalized logits) and its transpose, bf16 -------
    t1 = 128 if n % 128 == 0 else n
    ln, ln_t = pl.pallas_call(
        _prep_kernel,
        out_shape=(jax.ShapeDtypeStruct((n, n), jnp.bfloat16),
                   jax.ShapeDtypeStruct((n, n), jnp.bfloat16)),
        grid=(n // t1,),
        in_specs=[pl.BlockSpec((t1, d), lambda i: (i, 0)),
                  pl.BlockSpec((d, n), lambda i: (0, 0))],
        out_specs=(pl.BlockSpec((t1, n), lambda i: (i, 0)),
                   pl.BlockSpec((n, t1), lambda i: (0, i))),
        compiler_params=pltpu.CompilerParams(
            dimension_semantics=("parallel",),
            vmem_limit_bytes=_vmem_limit(28 * t1 * n + 8 * n * d + (2 << 20))),
        cost_estimate=pl.CostEstimate(flops=2 * n * n * d + 8 * n * d,
                                      transcendentals=3 * n,
                                      bytes_accessed=8 * n * d + 4 * n * n),
    )(f, f.T)

    # ---- pass 2: flash-style masked LSE --------------------------------------
    t = _pick_tile(n)
    nk = n // t
    per_anchor, pos_cnt, neg_cnt = pl.pallas_call(
        functools.partial(_flash_kernel, inv_temp=float(1.0 / temperature)),
        out_shape=(jax.ShapeDtypeStruct((n, 1), jnp.float32),
                   jax.ShapeDtypeStruct((n, 1), jnp.float32),
                   jax.ShapeDtypeStruct((n, 1), jnp.float32)),
        grid=(nk, nk),
        in_specs=[pl.BlockSpec((t, 1), lambda i, k: (i, 0)),   # labels (col)
                  pl.BlockSpec((1, t), lambda i, k: (0, k)),   # labels (row)
                  pl.BlockSpec((t, n), lambda i, k: (i, 0)),   # ln   row tile
                  pl.BlockSpec((n, t), lambda i, k: (0, k))],  # ln^T col tile
        out_specs=(pl.BlockSpec((t, 1), lambda i, k: (i, 0)),
                   pl.BlockSpec((t, 1), lambda i, k: (i, 0)),
                   pl.BlockSpec((t, 1), lambda i, k: (i, 0))),
        scratch_shapes=[pltpu.VMEM((t, 1), jnp.float32) for _ in range(5)],
        compiler_params=pltpu.CompilerParams(
            dimension_semantics=("parallel", "arbitrary"),
            vmem_limit_bytes=_vmem_limit(8 * t * n + 32 * t * t + (2 << 20))),
        cost_estimate=pl.CostEstimate(flops=2 * n * n * n + 12 * n * n,
                                      transcendentals=n * n,
                                      bytes_accessed=2 * n * n * (nk + 1) + 16 * n),
    )(lab_col, lab_row, ln, ln_t)

    # ---- O(N) finish: AvgNonZeroReducer + GenericPairLoss guard (plain JAX) ---
    per_anchor = per_anchor[:, 0]
    nz = per_anchor > 0
    cnt = jnp.sum(nz.astype(jnp.float32))
    total = jnp.sum(jnp.where(nz, per_anchor, 0.0))
    reduced = jnp.where(cnt > 0, total / jnp.maximum(cnt, 1.0), 0.0)
    valid = jnp.logical_and(jnp.sum(pos_cnt) > 0, jnp.sum(neg_cnt) > 0)
    return jnp.where(valid, reduced, 0.0)


# --------------------------------------------------------------------------- #
# pure-JAX reference (same semantics as the PyTorch module)
# --------------------------------------------------------------------------- #
def _reference(feature_vectors, labels, temperature=0.1, matmul_dtype=jnp.float32):
    labels = labels.reshape(-1)
    f = feature_vectors.astype(jnp.float32)
    fn = f * lax.rsqrt(jnp.maximum(jnp.sum(f * f, axis=1, keepdims=True), _EPS2))
    logits = fn @ fn.T
    ln = logits * lax.rsqrt(jnp.maximum(jnp.sum(logits * logits, axis=1,
                                                keepdims=True), _EPS2))
    lnc = ln.astype(matmul_dtype)
    mat = jnp.dot(lnc, lnc.T, preferred_element_type=jnp.float32) / temperature
    same = labels[:, None] == labels[None, :]
    diag = jnp.eye(mat.shape[0], dtype=bool)
    pos = same & ~diag
    neg = ~same
    matc = mat - jnp.max(mat, axis=1, keepdims=True)
    masked = jnp.where(pos | neg, matc, jnp.finfo(jnp.float32).min)
    denom = jax.scipy.special.logsumexp(masked, axis=1, keepdims=True)
    log_prob = matc - denom
    posf = pos.astype(jnp.float32)
    mlpp = jnp.sum(posf * log_prob, axis=1) / (jnp.sum(posf, axis=1)
                                               + jnp.finfo(jnp.float32).tiny)
    per = -mlpp
    nz = per > 0
    cnt = jnp.sum(nz)
    red = jnp.where(cnt > 0,
                    jnp.sum(jnp.where(nz, per, 0.0)) / jnp.maximum(cnt, 1), 0.0)
    return jnp.where(jnp.any(pos) & jnp.any(neg), red, 0.0)


if __name__ == "__main__":
    key = jax.random.PRNGKey(0)
    N, D = 8, 32
    features = jax.random.normal(key, (N, D), dtype=jnp.float32)
    labels = jnp.array([[0], [1], [0], [1], [2], [2], [0], [1]], dtype=jnp.int32)

    loss = supervised_contrastive_loss(features, labels, temperature=0.1)
    loss = jax.block_until_ready(loss)

    # Tight check vs a reference that matches the kernel's bf16 ln@ln.T matmul.
    ref_bf16 = _reference(features, labels, 0.1, matmul_dtype=jnp.bfloat16)
    # Loose check vs the full-f32 reference (bf16 MXU rounding on the big matmul).
    ref_f32 = _reference(features, labels, 0.1, matmul_dtype=jnp.float32)

    assert jnp.allclose(loss, ref_bf16, rtol=2e-3, atol=2e-3), (loss, ref_bf16)
    assert jnp.allclose(loss, ref_f32, rtol=1e-1, atol=5e-2), (loss, ref_f32)

    print("KERNEL_OK")
</pallas_src>

<mosaic_0001>
module attributes {stable_mosaic.version = 11 : i64} {
  func.func @_prep_kernel(%arg0: i32, %arg1: memref<8x32xf32, #tpu.memory_space<vmem>>, %arg2: memref<32x8xf32, #tpu.memory_space<vmem>>, %arg3: memref<8x8xbf16, #tpu.memory_space<vmem>>, %arg4: memref<8x8xbf16, #tpu.memory_space<vmem>>) attributes {dimension_semantics = [#tpu.dimension_semantics<parallel>], iteration_bounds = array<i64: 1>, scalar_prefetch = 0 : i64, scratch_operands = 0 : i64, tpu.core_type = #tpu.core_type<tc>, window_params = [{transform_indices = @transform_0, window_bounds = array<i64: 8, 32>}, {pipeline_mode = #tpu.pipeline_mode<synchronous>, transform_indices = @transform_1, window_bounds = array<i64: 32, 8>}, {transform_indices = @transform_2, window_bounds = array<i64: 8, 8>}, {transform_indices = @transform_3, window_bounds = array<i64: 8, 8>}]} {
    %c0 = arith.constant 0 : index
    %c0_0 = arith.constant 0 : index
    %0 = vector.load %arg1[%c0, %c0_0] : memref<8x32xf32, #tpu.memory_space<vmem>>, vector<8x32xf32>
    %1 = arith.mulf %0, %0 : vector<8x32xf32>
    %cst = arith.constant dense<0.000000e+00> : vector<8xf32>
    %2 = vector.multi_reduction <add>, %1, %cst [1] : vector<8x32xf32> to vector<8xf32>
    %3 = vector.shape_cast %2 : vector<8xf32> to vector<8x1xf32>
    %cst_1 = arith.constant 1.000000e-24 : f32
    %4 = vector.broadcast %cst_1 : f32 to vector<8x1xf32>
    %5 = arith.maximumf %3, %4 : vector<8x1xf32>
    %6 = math.rsqrt %5 : vector<8x1xf32>
    %7 = vector.broadcast %6 : vector<8x1xf32> to vector<8x32xf32>
    %8 = arith.mulf %0, %7 : vector<8x32xf32>
    %c0_2 = arith.constant 0 : index
    %c0_3 = arith.constant 0 : index
    %9 = vector.load %arg2[%c0_2, %c0_3] : memref<32x8xf32, #tpu.memory_space<vmem>>, vector<32x8xf32>
    %10 = arith.mulf %9, %9 : vector<32x8xf32>
    %cst_4 = arith.constant dense<0.000000e+00> : vector<8xf32>
    %11 = vector.multi_reduction <add>, %10, %cst_4 [0] : vector<32x8xf32> to vector<8xf32>
    %12 = vector.shape_cast %11 : vector<8xf32> to vector<1x8xf32>
    %cst_5 = arith.constant 1.000000e-24 : f32
    %13 = vector.broadcast %cst_5 : f32 to vector<1x8xf32>
    %14 = arith.maximumf %12, %13 : vector<1x8xf32>
    %15 = math.rsqrt %14 : vector<1x8xf32>
    %16 = vector.broadcast %15 : vector<1x8xf32> to vector<32x8xf32>
    %17 = arith.mulf %9, %16 : vector<32x8xf32>
    %cst_6 = arith.constant dense<0.000000e+00> : vector<8x8xf32>
    %18 = tpu.matmul %8, %17, %cst_6 {dimension_numbers = #tpu.dot_dimension_numbers<[1], [0], [0], [1], [0, 0, 1, 1], [], []>} : vector<8x32xf32>, vector<32x8xf32>, vector<8x8xf32> -> vector<8x8xf32>
    %19 = arith.mulf %18, %18 : vector<8x8xf32>
    %cst_7 = arith.constant dense<0.000000e+00> : vector<8xf32>
    %20 = vector.multi_reduction <add>, %19, %cst_7 [1] : vector<8x8xf32> to vector<8xf32>
    %21 = vector.shape_cast %20 : vector<8xf32> to vector<8x1xf32>
    %cst_8 = arith.constant 1.000000e-24 : f32
    %22 = vector.broadcast %cst_8 : f32 to vector<8x1xf32>
    %23 = arith.maximumf %21, %22 : vector<8x1xf32>
    %24 = math.rsqrt %23 : vector<8x1xf32>
    %25 = vector.broadcast %24 : vector<8x1xf32> to vector<8x8xf32>
    %26 = arith.mulf %18, %25 : vector<8x8xf32>
    %27 = arith.truncf %26 : vector<8x8xf32> to vector<8x8xbf16>
    %c0_9 = arith.constant 0 : index
    %c0_10 = arith.constant 0 : index
    %28 = vector.load %arg3[%c0_9, %c0_10] : memref<8x8xbf16, #tpu.memory_space<vmem>>, vector<8x8xbf16>
    tpu.vector_store %arg3[%c0_9, %c0_10], %27 {strides = array<i32>} : memref<8x8xbf16, #tpu.memory_space<vmem>>, vector<8x8xbf16>,
    %29 = tpu.transpose %26, [1, 0] : vector<8x8xf32> -> vector<8x8xf32>
    %30 = arith.truncf %29 : vector<8x8xf32> to vector<8x8xbf16>
    %c0_11 = arith.constant 0 : index
    %c0_12 = arith.constant 0 : index
    %31 = vector.load %arg4[%c0_11, %c0_12] : memref<8x8xbf16, #tpu.memory_space<vmem>>, vector<8x8xbf16>
    tpu.vector_store %arg4[%c0_11, %c0_12], %30 {strides = array<i32>} : memref<8x8xbf16, #tpu.memory_space<vmem>>, vector<8x8xbf16>,
    return
  }
  func.func @transform_0(%arg0: i32) -> (i32, i32) {
    %c0_i32 = arith.constant 0 : i32
    %c0_i32_0 = arith.constant 0 : i32
    return %arg0, %c0_i32 : i32, i32
  }
  func.func @transform_1(%arg0: i32) -> (i32, i32) {
    %c0_i32 = arith.constant 0 : i32
    %c0_i32_0 = arith.constant 0 : i32
    %c0_i32_1 = arith.constant 0 : i32
    return %c0_i32, %c0_i32_0 : i32, i32
  }
  func.func @transform_2(%arg0: i32) -> (i32, i32) {
    %c0_i32 = arith.constant 0 : i32
    %c0_i32_0 = arith.constant 0 : i32
    return %arg0, %c0_i32 : i32, i32
  }
  func.func @transform_3(%arg0: i32) -> (i32, i32) {
    %c0_i32 = arith.constant 0 : i32
    %c0_i32_0 = arith.constant 0 : i32
    return %c0_i32, %arg0 : i32, i32
  }
}

</mosaic_0001>

<bundles_post_ra>
// kernel: tpu_custom_call.1
= control target key start
LH: loop header
LB: loop body
LE: loop exit
PB: predicated region body
PF: predicated region fallthrough
CT: control target
= control target key end

     0   :  { %9 = vsyncpa [#allocation3], 0  ;;  %vm17_vm0 = vcmask 261120   ;;  %vm32_vm1 = vcmask 64512   ;;  %s352_s0 = inlined_call_operand.vmem [shape: f32[8,32], index: 0, kind: input, shape index: {}]   ;;  %s353_s1 = inlined_call_operand.vmem [shape: f32[32,8], index: 1, kind: input, shape index: {}]   ;;  %s354_s2 = inlined_call_operand.hbm [shape: bf16[8,8], index: 2, kind: output, shape index: {0}]   ;;  %s355_s3 = inlined_call_operand.hbm [shape: bf16[8,8], index: 3, kind: output, shape index: {1}]  }
   0x1   :  { %v15_v0 = vld [vmem:[%s352_s0] sm:$0xff]  ;;  %v25_v2 = vld [vmem:[%s353_s1 + $0x8] sm:$0xff]  ;;  %v26_v4 = vld [vmem:[%s353_s1 + $0x10] sm:$0xff] }
   0x2   :  { %v24_v1 = vld [vmem:[%s353_s1] sm:$0xff]  ;;  %v16_v3 = vmul.f32 %v15_v0, %v15_v0  ;;  %v27_v5 = vld [vmem:[%s353_s1 + $0x18] sm:$0xff]  ;;  %v29_v7 = vmul.f32 %v25_v2, %v25_v2 }
   0x3   :  { %v28_v6 = vmul.f32 %v24_v1, %v24_v1 }
   0x4   :  { %10 = vsyncpa [#allocation5], 0  ;;  %v30_v8 = vmul.f32 %v26_v4, %v26_v4  ;;  %v31_v9 = vmul.f32 %v27_v5, %v27_v5  ;;  %v18_v10 = vsel %vm17_vm0, %v16_v3, 0.0  ;;  %v34_v12 = vsel %vm32_vm1, %v29_v7, 0.0  ;;  %s282_s0 = smov [#allocation2]  }
   0x5   :  { %v33_v11 = vsel %vm32_vm1, %v28_v6, 0.0  ;;  %19 = vadd.xlane.f32.xlu0 %v18_v10  ;;  %v279_v24 = vmov 0.0|0.0   ;;  %vm280_vm2 = vmmov 0   ;;  %v281_v25 = vmov 0.0   ;;  %s175_s1 = sshll.u32 %s282_s0, 4  ;;  %s176_s1 = int_to_ptr.vmem [resolvable:$true] %s175_s1 }
   0x6   :  { %v35_v13 = vadd.f32 %v34_v12, %v33_v11  ;;  %v36_v14 = vsel %vm32_vm1, %v30_v8, 0.0  ;;  %v38_v15 = vsel %vm32_vm1, %v31_v9, 0.0  ;;  %214 = vmatprep.subr.bf16.mxu0 %v279_v24  ;;  %211 = vmatprep.mubr.msk.f32.mxu0 %vm280_vm2, %v281_v25  ;;  %vm133_vm3 = vcmask 60416   ;;  %s231_s22 = scalar_lea.vmem %s176_s1, 64  ;;  %p236_p1 = scmp.lt.s32.totalorder %s176_s1, %s176_s1 }
   0x7   :  { %p232_p0 = scmp.ne.s32.totalorder %s176_s1, %s231_s22  ;;  %p237_p2 = scmp.lt.s32.totalorder %s231_s22, %s231_s22 }
   0x8   :  { %v37_v16 = vadd.f32 %v36_v14, %v35_v13 }
   0x9   :  { %p238_p3 = por %p237_p2, %p236_p1 }
   0xa   :  { %v39_v17 = vadd.f32 %v38_v15, %v37_v16 }
   0xb   :  { %p239_p4 = pnand %p238_p3, %p232_p0 }
   0xc   :  { %v40_v18 = vrot.slane %v39_v17, 4 }
   0xe   :  { %v41_v19 = vadd.f32 %v40_v18, %v39_v17 }
  0x10   :  { %v42_v20 = vrot.slane %v41_v19, 2 }
  0x12   :  { %v43_v21 = vadd.f32 %v42_v20, %v41_v19 }
  0x14   :  { %v44_v22 = vrot.slane %v43_v21, 1 }
  0x16   :  { %v45_v23 = vadd.f32 %v44_v22, %v43_v21 }
  0x18   :  { %v46_v26 = vmax.f32 %v45_v23, 1e-24 }
  0x1a   :  { %225 = vrsqrt.f32 %v46_v26 }
  0x24   :  { %v226_v27 = vpop.eup %225 }
  0x25   :  { %v48_v28 = vmul.f32 %v226_v27, %v24_v1  ;;  %v49_v29 = vmul.f32 %v226_v27, %v25_v2  ;;  %v50_v30 = vmul.f32 %v226_v27, %v26_v4  ;;  %v51_v31 = vmul.f32 %v226_v27, %v27_v5 }
  0x27   :  { %v215_v32 = vpack.c.bf16 %v49_v29, %v48_v28  ;;  %v218_v33 = vpack.c.bf16 %v51_v31, %v50_v30 }
  0x29   :  { %216 = vmatpush3.bf16.msra.mxu0 %v215_v32 }
  0x2a   :  { %217 = vmatprep.subr.bf16.mxu0 %v279_v24 }
  0x2d   :  { %219 = vmatpush3.bf16.msra.mxu0 %v218_v33 }
  0x92   :  { %v20_v34 = vpop.xlane.xlu0 %19 }
  0x93   :  { %v21_v35 = vmax.f32 %v20_v34, 1e-24 }
  0x95   :  { %227 = vrsqrt.f32 %v21_v35 }
  0x9f   :  { %v228_v36 = vpop.eup %227 }
  0xa0   :  { %v23_v37 = vmul.f32 %v228_v36, %v15_v0 }
  0xa2   :  { %212 = vmatmul.mubr.msk.f32.vlgmr.msra.gmra.mrb[0].mxu0 %vm17_vm0, %v23_v37 }
 0x175   :  { %v121_v38 = vpop.f32.mrb[0].mxu0 }
 0x176   :  { %v125_v39 = vmul.f32 %v121_v38, %v121_v38  ;;  %v213_v40 = vpop.f32.mrb[1].mxu0 }
 0x178   :  { %v126_v41 = vsel %vm32_vm1, %v125_v39, 0.0 }
 0x179   :  { %127 = vadd.xlane.f32.xlu0 %v126_v41 }
 0x206   :  { %v128_v42 = vpop.xlane.xlu0 %127 }
 0x207   :  { %v129_v43 = vmax.f32 %v128_v42, 1e-24 }
 0x209   :  { %229 = vrsqrt.f32 %v129_v43 }
 0x213   :  { %v230_v44 = vpop.eup %229 }
 0x214   :  { %v131_v45 = vmul.f32 %v230_v44, %v121_v38 }
 0x216   :  { %135 = vxpose.xlu1.b32.start.end [1/1] (short) (narrow) %v131_v45, 8  ;;  %v132_v46 = vpack.c.bf16 %v131_v45, %v131_v45 }
 0x218   :  { %134 = vst.msk [vmem:[#allocation2] sm:$0xf] %vm133_vm3, %v132_v46 }
 0x219   :  { %242 = shalt.err (!%p239_p4)
}
 0x21a   :  { %s243_s25 = scalar_lea.hbm %s354_s2, 64 }
 0x21b   :  { %p244_p5 = scmp.ne.s32.totalorder %s354_s2, %s243_s25  ;;  %p247_p6 = scmp.lt.u32.totalorder %s243_s25, %s354_s2 }
 0x21d   :  { %p249_p7 = pnand %p247_p6, %p244_p5 }
 0x21f   :  { %252 = shalt.err (!%p249_p7)
}
 0x220   :  { %178 = dma.vmem_to_hbm [thread:$0]  %s176_s1, 64, %s354_s2, [#allocation3]  }
 0x221   :  { %s283_s5 = smov [#allocation4]  }
 0x222   :  { %s185_s6 = sshll.u32 %s283_s5, 4  ;;  %s186_s6 = int_to_ptr.vmem [resolvable:$true] %s185_s6 }
 0x223   :  { %s253_s7 = scalar_lea.vmem %s186_s6, 64  ;;  %p258_p9 = scmp.lt.s32.totalorder %s186_s6, %s186_s6 }
 0x224   :  { %p254_p8 = scmp.ne.s32.totalorder %s186_s6, %s253_s7  ;;  %p259_p10 = scmp.lt.s32.totalorder %s253_s7, %s253_s7 }
 0x226   :  { %p260_p11 = por %p259_p10, %p258_p9 }
 0x228   :  { %p261_p12 = pnand %p260_p11, %p254_p8 }
 0x296   :  { %v151_v47 = vpop.trf.xlu1 }
 0x297   :  { %v167_v48 = vpack.c.bf16 %v151_v47, %v151_v47 }
 0x299   :  { %168 = vst.msk [vmem:[#allocation4] sm:$0xf] %vm133_vm3, %v167_v48 }
 0x29a   :  { %264 = shalt.err (!%p261_p12)
}
 0x29b   :  { %s265_s10 = scalar_lea.hbm %s355_s3, 64 }
 0x29c   :  { %p266_p13 = scmp.ne.s32.totalorder %s355_s3, %s265_s10  ;;  %p269_p0 = scmp.lt.u32.totalorder %s265_s10, %s355_s3 }
 0x29e   :  { %p271_p1 = pnand %p269_p0, %p266_p13 }
 0x2a0   :  { %274 = shalt.err (!%p271_p1)
}
 0x2a1   :  { %188 = dma.vmem_to_hbm [thread:$0]  %s186_s6, 64, %s355_s3, [#allocation5]  }
 0x2a2   :  { %275 = dma.done.wait [#allocation3], 64  }
 0x2a3   :  { %276 = vsyncadd [#allocation3], 4294967232 }
 0x2a4   :  { %277 = dma.done.wait [#allocation5], 64  }
 0x2a5   :  { %278 = vsyncadd [#allocation5], 4294967232 }
 0x2a6   :  { %195 = vsyncpa [#allocation3], 1 }
 0x2a7   :  { %196 = vsyncpa [#allocation5], 1 }

</bundles_post_ra>
